<compile_context>
chip_gen: v7x
topology: tpu7x:2x2x1
jax: 0.10.0
libtpu: 0.0.40
codegen_flags: <defaults>
</compile_context>

<pallas_src>
import functools
import math

import jax
import jax.numpy as jnp
from jax.experimental import pallas as pl
from jax.experimental.pallas import tpu as pltpu

# ----------------------------- configuration ------------------------------- #
B = 2          # batch
N = 8          # sequence length
DIM = 32       # model dim
DH = 16        # dim_head
H = 2          # heads
FF_MULT = 2
AI = DH * H              # attn_inner_dim
FFI = DIM * FF_MULT      # ff_inner_dim
FUSED = AI + DH + DH + 2 * FFI
BN = B * N
SCALE = DH ** (-0.5)
LN_EPS = 1e-5
NEG_MAX = float(jnp.finfo(jnp.float32).max)   # reference only
MASK_VAL = -1e30                              # bounded additive mask (kernel)


# ------------------------------- the kernel -------------------------------- #
def _block_kernel(x_ref, gamma_ref, beta_ref,
                  wq_ref, wk_ref, wv_ref, wffx_ref, wffg_ref,
                  wa_ref, wffo_ref,
                  cosq_ref, sinq_ref, cosk_ref, sink_ref,
                  pq_ref, pk_ref, mask_ref, o_ref):
    x = x_ref[...]                                 # (BN, DIM)  all batches at once
    gamma = gamma_ref[...]                         # (1, DIM)
    beta = beta_ref[...]                           # (1, DIM)

    # --- LayerNorm (F.layer_norm over last dim, eps=1e-5) ---
    mu = jnp.mean(x, axis=-1, keepdims=True)
    var = jnp.mean((x - mu) ** 2, axis=-1, keepdims=True)
    xn = (x - mu) * jax.lax.rsqrt(var + LN_EPS) * gamma + beta   # (BN, DIM)

    # --- projections (fused weight pre-split on host; lane-aligned outputs) ---
    q = jnp.dot(xn, wq_ref[...], preferred_element_type=jnp.float32)      # (BN, AI)
    k = jnp.dot(xn, wk_ref[...], preferred_element_type=jnp.float32)      # (BN, DH)
    v = jnp.dot(xn, wv_ref[...], preferred_element_type=jnp.float32)      # (BN, DH)
    ff_x = jnp.dot(xn, wffx_ref[...], preferred_element_type=jnp.float32)  # (BN, FFI)
    gate = jnp.dot(xn, wffg_ref[...], preferred_element_type=jnp.float32)  # (BN, FFI)

    # --- RoPE: rotate_half(t) == t @ P (signed permutation; MXU, no relayout).
    #     cos/sin tables are host-tiled per row; attention scale folded into q's.
    q = q * cosq_ref[...] + jnp.dot(q, pq_ref[...],
                                    preferred_element_type=jnp.float32) * sinq_ref[...]
    k = k * cosk_ref[...] + jnp.dot(k, pk_ref[...],
                                    preferred_element_type=jnp.float32) * sink_ref[...]

    mask = mask_ref[...]                           # (BN, BN) additive 0 / -1e30
    wa = wa_ref[...]                               # (AI, DIM)

    # --- multi-query attention over flattened rows; accumulate attn_out per head ---
    attn_out = jnp.zeros((BN, DIM), jnp.float32)
    for h in range(H):
        qh = q[:, h * DH:(h + 1) * DH]             # (BN, DH)
        sim = jax.lax.dot_general(qh, k, (((1,), (1,)), ((), ())),
                                  preferred_element_type=jnp.float32)     # (BN, BN)
        sim = sim + mask                           # block-diag causal additive mask
        sim = sim - jnp.max(sim, axis=-1, keepdims=True)
        p = jnp.exp(sim)
        p = p * pl.reciprocal(jnp.sum(p, axis=-1, keepdims=True), approx=True)
        oh = jnp.dot(p, v, preferred_element_type=jnp.float32)            # (BN, DH)
        attn_out = attn_out + jnp.dot(oh, wa[h * DH:(h + 1) * DH, :],
                                      preferred_element_type=jnp.float32)

    # --- SwiGLU feed-forward ---
    sw = (gate * jax.nn.sigmoid(gate)) * ff_x                             # silu(gate)*x
    ff_out = jnp.dot(sw, wffo_ref[...], preferred_element_type=jnp.float32)

    o_ref[...] = (attn_out + ff_out).astype(o_ref.dtype)


# ------------------------------ host wrapper -------------------------------- #
@functools.partial(jax.jit, static_argnames=())
def parallel_transformer_block(x, gamma, beta, w_fused, w_attn_out, w_ff_out):
    # split fused projection weight into lane-aligned segments (host-side, free)
    w_q = w_fused[:, :AI]
    w_k = w_fused[:, AI:AI + DH]
    w_v = w_fused[:, AI + DH:AI + 2 * DH]
    w_ffx = w_fused[:, AI + 2 * DH:AI + 2 * DH + FFI]
    w_ffg = w_fused[:, AI + 2 * DH + FFI:]

    # rotary tables (glue; tiny, computed host-side)
    inv_freq = 1.0 / (10000.0 ** (jnp.arange(0, DH, 2, dtype=jnp.float32) / DH))
    seq = jnp.arange(N, dtype=jnp.float32)
    freqs = seq[:, None] * inv_freq[None, :]               # (N, DH//2)
    pos = jnp.concatenate([freqs, freqs], axis=-1)         # (N, DH)
    cos_pos = jnp.cos(pos)
    sin_pos = jnp.sin(pos)
    cos_k = jnp.tile(cos_pos, (B, 1))                      # (BN, DH)
    sin_k = jnp.tile(sin_pos, (B, 1))
    cos_q = jnp.tile(cos_pos, (B, H)) * SCALE              # (BN, AI), scale folded in
    sin_q = jnp.tile(sin_pos, (B, H)) * SCALE

    # rotate_half as signed permutation:  rotate_half(t) == t @ P
    eye = jnp.eye(DH // 2, dtype=jnp.float32)
    zeros = jnp.zeros((DH // 2, DH // 2), jnp.float32)
    P_k = jnp.block([[zeros, eye], [-eye, zeros]])         # (DH, DH)
    P_q = jnp.kron(jnp.eye(H, dtype=jnp.float32), P_k)     # (AI, AI) block-diag

    # additive attention mask over flattened (B*N) rows: same batch AND causal
    ridx = jnp.arange(BN)
    r_b, r_p = ridx // N, ridx % N
    allowed = (r_b[:, None] == r_b[None, :]) & (r_p[None, :] <= r_p[:, None])
    mask_bias = jnp.where(allowed, 0.0, MASK_VAL).astype(jnp.float32)     # (BN, BN)

    gamma2 = gamma.reshape(1, DIM)
    beta2 = beta.reshape(1, DIM)
    x_flat = x.reshape(BN, DIM)

    grid_spec = pltpu.PrefetchScalarGridSpec(
        num_scalar_prefetch=0,
        grid=(1,),                                     # single step: whole problem
        in_specs=[
            pl.BlockSpec((BN, DIM), lambda i: (0, 0)),     # x (flattened batch)
            pl.BlockSpec((1, DIM), lambda i: (0, 0)),      # gamma
            pl.BlockSpec((1, DIM), lambda i: (0, 0)),      # beta
            pl.BlockSpec((DIM, AI), lambda i: (0, 0)),     # w_q
            pl.BlockSpec((DIM, DH), lambda i: (0, 0)),     # w_k
            pl.BlockSpec((DIM, DH), lambda i: (0, 0)),     # w_v
            pl.BlockSpec((DIM, FFI), lambda i: (0, 0)),    # w_ffx
            pl.BlockSpec((DIM, FFI), lambda i: (0, 0)),    # w_ffgate
            pl.BlockSpec((AI, DIM), lambda i: (0, 0)),     # w_attn_out
            pl.BlockSpec((FFI, DIM), lambda i: (0, 0)),    # w_ff_out
            pl.BlockSpec((BN, AI), lambda i: (0, 0)),      # cos_q (scaled)
            pl.BlockSpec((BN, AI), lambda i: (0, 0)),      # sin_q (scaled)
            pl.BlockSpec((BN, DH), lambda i: (0, 0)),      # cos_k
            pl.BlockSpec((BN, DH), lambda i: (0, 0)),      # sin_k
            pl.BlockSpec((AI, AI), lambda i: (0, 0)),      # P_q
            pl.BlockSpec((DH, DH), lambda i: (0, 0)),      # P_k
            pl.BlockSpec((BN, BN), lambda i: (0, 0)),      # additive causal mask
        ],
        out_specs=pl.BlockSpec((BN, DIM), lambda i: (0, 0)),
    )

    out_flat = pl.pallas_call(
        _block_kernel,
        out_shape=jax.ShapeDtypeStruct((BN, DIM), jnp.float32),
        grid_spec=grid_spec,
        compiler_params=pltpu.CompilerParams(
            dimension_semantics=("arbitrary",)),
    )(x_flat, gamma2, beta2, w_q, w_k, w_v, w_ffx, w_ffg,
      w_attn_out, w_ff_out, cos_q, sin_q, cos_k, sin_k, P_q, P_k, mask_bias)

    return out_flat.reshape(B, N, DIM)


# -------------------------- pure-JAX reference ------------------------------ #
def _reference(x, gamma, beta, w_fused, w_attn_out, w_ff_out):
    mu = jnp.mean(x, axis=-1, keepdims=True)
    var = jnp.mean((x - mu) ** 2, axis=-1, keepdims=True)
    xn = (x - mu) / jnp.sqrt(var + LN_EPS) * gamma + beta
    fused = xn @ w_fused
    q, k, v, ff = jnp.split(fused, [AI, AI + DH, AI + 2 * DH], axis=-1)
    q = q.reshape(B, N, H, DH).transpose(0, 2, 1, 3)         # b h n d

    inv_freq = 1.0 / (10000.0 ** (jnp.arange(0, DH, 2, dtype=jnp.float32) / DH))
    freqs = jnp.arange(N, dtype=jnp.float32)[:, None] * inv_freq[None, :]
    pos = jnp.concatenate([freqs, freqs], axis=-1)

    def rot_half(t):
        t1, t2 = t[..., :DH // 2], t[..., DH // 2:]
        return jnp.concatenate([-t2, t1], axis=-1)

    def rope(t):
        return t * jnp.cos(pos) + rot_half(t) * jnp.sin(pos)

    q = rope(q) * SCALE
    k = rope(k)
    sim = jnp.einsum('bhid,bjd->bhij', q, k)
    causal = jnp.triu(jnp.ones((N, N), dtype=bool), 1)
    sim = jnp.where(causal, -NEG_MAX, sim)
    sim = sim - jnp.max(sim, axis=-1, keepdims=True)
    attn = jax.nn.softmax(sim, axis=-1)
    out = jnp.einsum('bhij,bjd->bhid', attn, v)
    out = out.transpose(0, 2, 1, 3).reshape(B, N, AI)
    ff_x, gate = ff[..., :FFI], ff[..., FFI:]
    sw = jax.nn.silu(gate) * ff_x
    return out @ w_attn_out + sw @ w_ff_out


# --------------------------------- main ------------------------------------- #
if __name__ == "__main__":
    key = jax.random.PRNGKey(0)
    kx, k1, k2, k3 = jax.random.split(key, 4)

    x = jax.random.normal(kx, (B, N, DIM), dtype=jnp.float32)

    # deterministic parameter init (nn.Linear-style uniform fan-in scaling)
    def init_w(k, fan_in, fan_out):
        bound = 1.0 / math.sqrt(fan_in)
        return jax.random.uniform(k, (fan_in, fan_out), jnp.float32, -bound, bound)

    gamma = jnp.ones((DIM,), jnp.float32)
    beta = jnp.zeros((DIM,), jnp.float32)
    w_fused = init_w(k1, DIM, FUSED)
    w_attn_out = init_w(k2, AI, DIM)
    w_ff_out = init_w(k3, FFI, DIM)

    out = parallel_transformer_block(x, gamma, beta, w_fused, w_attn_out, w_ff_out)
    out = jax.block_until_ready(out)

    ref = _reference(x, gamma, beta, w_fused, w_attn_out, w_ff_out)
    assert out.shape == (B, N, DIM)
    # tolerance slightly loosened vs 1e-4 because the softmax denominator uses
    # the EUP approximate reciprocal (per perf guidance).
    assert jnp.allclose(out, ref, atol=2e-3, rtol=2e-3), "mismatch vs reference"

    print("KERNEL_OK")
</pallas_src>

<mosaic_0001>
module attributes {stable_mosaic.version = 11 : i64} {
  func.func @_block_kernel(%arg0: i32, %arg1: memref<16x32xf32, #tpu.memory_space<vmem>>, %arg2: memref<1x32xf32, #tpu.memory_space<vmem>>, %arg3: memref<1x32xf32, #tpu.memory_space<vmem>>, %arg4: memref<32x32xf32, #tpu.memory_space<vmem>>, %arg5: memref<32x16xf32, #tpu.memory_space<vmem>>, %arg6: memref<32x16xf32, #tpu.memory_space<vmem>>, %arg7: memref<32x64xf32, #tpu.memory_space<vmem>>, %arg8: memref<32x64xf32, #tpu.memory_space<vmem>>, %arg9: memref<32x32xf32, #tpu.memory_space<vmem>>, %arg10: memref<64x32xf32, #tpu.memory_space<vmem>>, %arg11: memref<16x32xf32, #tpu.memory_space<vmem>>, %arg12: memref<16x32xf32, #tpu.memory_space<vmem>>, %arg13: memref<16x16xf32, #tpu.memory_space<vmem>>, %arg14: memref<16x16xf32, #tpu.memory_space<vmem>>, %arg15: memref<32x32xf32, #tpu.memory_space<vmem>>, %arg16: memref<16x16xf32, #tpu.memory_space<vmem>>, %arg17: memref<16x16xf32, #tpu.memory_space<vmem>>, %arg18: memref<16x32xf32, #tpu.memory_space<vmem>>) attributes {dimension_semantics = [#tpu.dimension_semantics<arbitrary>], iteration_bounds = array<i64: 1>, scalar_prefetch = 0 : i64, scratch_operands = 0 : i64, tpu.core_type = #tpu.core_type<tc>, window_params = [{pipeline_mode = #tpu.pipeline_mode<synchronous>, transform_indices = @transform_0, window_bounds = array<i64: 16, 32>}, {pipeline_mode = #tpu.pipeline_mode<synchronous>, transform_indices = @transform_1, window_bounds = array<i64: 1, 32>}, {pipeline_mode = #tpu.pipeline_mode<synchronous>, transform_indices = @transform_2, window_bounds = array<i64: 1, 32>}, {pipeline_mode = #tpu.pipeline_mode<synchronous>, transform_indices = @transform_3, window_bounds = array<i64: 32, 32>}, {pipeline_mode = #tpu.pipeline_mode<synchronous>, transform_indices = @transform_4, window_bounds = array<i64: 32, 16>}, {pipeline_mode = #tpu.pipeline_mode<synchronous>, transform_indices = @transform_5, window_bounds = array<i64: 32, 16>}, {pipeline_mode = #tpu.pipeline_mode<synchronous>, transform_indices = @transform_6, window_bounds = array<i64: 32, 64>}, {pipeline_mode = #tpu.pipeline_mode<synchronous>, transform_indices = @transform_7, window_bounds = array<i64: 32, 64>}, {pipeline_mode = #tpu.pipeline_mode<synchronous>, transform_indices = @transform_8, window_bounds = array<i64: 32, 32>}, {pipeline_mode = #tpu.pipeline_mode<synchronous>, transform_indices = @transform_9, window_bounds = array<i64: 64, 32>}, {pipeline_mode = #tpu.pipeline_mode<synchronous>, transform_indices = @transform_10, window_bounds = array<i64: 16, 32>}, {pipeline_mode = #tpu.pipeline_mode<synchronous>, transform_indices = @transform_11, window_bounds = array<i64: 16, 32>}, {pipeline_mode = #tpu.pipeline_mode<synchronous>, transform_indices = @transform_12, window_bounds = array<i64: 16, 16>}, {pipeline_mode = #tpu.pipeline_mode<synchronous>, transform_indices = @transform_13, window_bounds = array<i64: 16, 16>}, {pipeline_mode = #tpu.pipeline_mode<synchronous>, transform_indices = @transform_14, window_bounds = array<i64: 32, 32>}, {pipeline_mode = #tpu.pipeline_mode<synchronous>, transform_indices = @transform_15, window_bounds = array<i64: 16, 16>}, {pipeline_mode = #tpu.pipeline_mode<synchronous>, transform_indices = @transform_16, window_bounds = array<i64: 16, 16>}, {pipeline_mode = #tpu.pipeline_mode<synchronous>, transform_indices = @transform_17, window_bounds = array<i64: 16, 32>}]} {
    %c0 = arith.constant 0 : index
    %c0_0 = arith.constant 0 : index
    %0 = vector.load %arg1[%c0, %c0_0] : memref<16x32xf32, #tpu.memory_space<vmem>>, vector<16x32xf32>
    %c0_1 = arith.constant 0 : index
    %c0_2 = arith.constant 0 : index
    %1 = vector.load %arg2[%c0_1, %c0_2] : memref<1x32xf32, #tpu.memory_space<vmem>>, vector<1x32xf32>
    %c0_3 = arith.constant 0 : index
    %c0_4 = arith.constant 0 : index
    %2 = vector.load %arg3[%c0_3, %c0_4] : memref<1x32xf32, #tpu.memory_space<vmem>>, vector<1x32xf32>
    %cst = arith.constant dense<0.000000e+00> : vector<16xf32>
    %3 = vector.multi_reduction <add>, %0, %cst [1] : vector<16x32xf32> to vector<16xf32>
    %4 = vector.shape_cast %3 : vector<16xf32> to vector<16x1xf32>
    %cst_5 = arith.constant 3.200000e+01 : f32
    %5 = vector.broadcast %cst_5 : f32 to vector<16x1xf32>
    %6 = arith.divf %4, %5 : vector<16x1xf32>
    %7 = vector.broadcast %6 : vector<16x1xf32> to vector<16x32xf32>
    %8 = arith.subf %0, %7 : vector<16x32xf32>
    %9 = arith.mulf %8, %8 : vector<16x32xf32>
    %cst_6 = arith.constant dense<0.000000e+00> : vector<16xf32>
    %10 = vector.multi_reduction <add>, %9, %cst_6 [1] : vector<16x32xf32> to vector<16xf32>
    %11 = vector.shape_cast %10 : vector<16xf32> to vector<16x1xf32>
    %cst_7 = arith.constant 3.200000e+01 : f32
    %12 = vector.broadcast %cst_7 : f32 to vector<16x1xf32>
    %13 = arith.divf %11, %12 : vector<16x1xf32>
    %14 = vector.broadcast %6 : vector<16x1xf32> to vector<16x32xf32>
    %15 = arith.subf %0, %14 : vector<16x32xf32>
    %cst_8 = arith.constant 9.99999974E-6 : f32
    %16 = vector.broadcast %cst_8 : f32 to vector<16x1xf32>
    %17 = arith.addf %13, %16 : vector<16x1xf32>
    %18 = math.rsqrt %17 : vector<16x1xf32>
    %19 = vector.broadcast %18 : vector<16x1xf32> to vector<16x32xf32>
    %20 = arith.mulf %15, %19 : vector<16x32xf32>
    %21 = vector.broadcast %1 : vector<1x32xf32> to vector<16x32xf32>
    %22 = arith.mulf %20, %21 : vector<16x32xf32>
    %23 = vector.broadcast %2 : vector<1x32xf32> to vector<16x32xf32>
    %24 = arith.addf %22, %23 : vector<16x32xf32>
    %c0_9 = arith.constant 0 : index
    %c0_10 = arith.constant 0 : index
    %25 = vector.load %arg4[%c0_9, %c0_10] : memref<32x32xf32, #tpu.memory_space<vmem>>, vector<32x32xf32>
    %cst_11 = arith.constant dense<0.000000e+00> : vector<16x32xf32>
    %26 = tpu.matmul %24, %25, %cst_11 {dimension_numbers = #tpu.dot_dimension_numbers<[1], [0], [0], [1], [0, 0, 1, 1], [], []>} : vector<16x32xf32>, vector<32x32xf32>, vector<16x32xf32> -> vector<16x32xf32>
    %c0_12 = arith.constant 0 : index
    %c0_13 = arith.constant 0 : index
    %27 = vector.load %arg5[%c0_12, %c0_13] : memref<32x16xf32, #tpu.memory_space<vmem>>, vector<32x16xf32>
    %cst_14 = arith.constant dense<0.000000e+00> : vector<16x16xf32>
    %28 = tpu.matmul %24, %27, %cst_14 {dimension_numbers = #tpu.dot_dimension_numbers<[1], [0], [0], [1], [0, 0, 1, 1], [], []>} : vector<16x32xf32>, vector<32x16xf32>, vector<16x16xf32> -> vector<16x16xf32>
    %c0_15 = arith.constant 0 : index
    %c0_16 = arith.constant 0 : index
    %29 = vector.load %arg6[%c0_15, %c0_16] : memref<32x16xf32, #tpu.memory_space<vmem>>, vector<32x16xf32>
    %cst_17 = arith.constant dense<0.000000e+00> : vector<16x16xf32>
    %30 = tpu.matmul %24, %29, %cst_17 {dimension_numbers = #tpu.dot_dimension_numbers<[1], [0], [0], [1], [0, 0, 1, 1], [], []>} : vector<16x32xf32>, vector<32x16xf32>, vector<16x16xf32> -> vector<16x16xf32>
    %c0_18 = arith.constant 0 : index
    %c0_19 = arith.constant 0 : index
    %31 = vector.load %arg7[%c0_18, %c0_19] : memref<32x64xf32, #tpu.memory_space<vmem>>, vector<32x64xf32>
    %cst_20 = arith.constant dense<0.000000e+00> : vector<16x64xf32>
    %32 = tpu.matmul %24, %31, %cst_20 {dimension_numbers = #tpu.dot_dimension_numbers<[1], [0], [0], [1], [0, 0, 1, 1], [], []>} : vector<16x32xf32>, vector<32x64xf32>, vector<16x64xf32> -> vector<16x64xf32>
    %c0_21 = arith.constant 0 : index
    %c0_22 = arith.constant 0 : index
    %33 = vector.load %arg8[%c0_21, %c0_22] : memref<32x64xf32, #tpu.memory_space<vmem>>, vector<32x64xf32>
    %cst_23 = arith.constant dense<0.000000e+00> : vector<16x64xf32>
    %34 = tpu.matmul %24, %33, %cst_23 {dimension_numbers = #tpu.dot_dimension_numbers<[1], [0], [0], [1], [0, 0, 1, 1], [], []>} : vector<16x32xf32>, vector<32x64xf32>, vector<16x64xf32> -> vector<16x64xf32>
    %c0_24 = arith.constant 0 : index
    %c0_25 = arith.constant 0 : index
    %35 = vector.load %arg11[%c0_24, %c0_25] : memref<16x32xf32, #tpu.memory_space<vmem>>, vector<16x32xf32>
    %36 = arith.mulf %26, %35 : vector<16x32xf32>
    %c0_26 = arith.constant 0 : index
    %c0_27 = arith.constant 0 : index
    %37 = vector.load %arg15[%c0_26, %c0_27] : memref<32x32xf32, #tpu.memory_space<vmem>>, vector<32x32xf32>
    %cst_28 = arith.constant dense<0.000000e+00> : vector<16x32xf32>
    %38 = tpu.matmul %26, %37, %cst_28 {dimension_numbers = #tpu.dot_dimension_numbers<[1], [0], [0], [1], [0, 0, 1, 1], [], []>} : vector<16x32xf32>, vector<32x32xf32>, vector<16x32xf32> -> vector<16x32xf32>
    %c0_29 = arith.constant 0 : index
    %c0_30 = arith.constant 0 : index
    %39 = vector.load %arg12[%c0_29, %c0_30] : memref<16x32xf32, #tpu.memory_space<vmem>>, vector<16x32xf32>
    %40 = arith.mulf %38, %39 : vector<16x32xf32>
    %41 = arith.addf %36, %40 : vector<16x32xf32>
    %c0_31 = arith.constant 0 : index
    %c0_32 = arith.constant 0 : index
    %42 = vector.load %arg13[%c0_31, %c0_32] : memref<16x16xf32, #tpu.memory_space<vmem>>, vector<16x16xf32>
    %43 = arith.mulf %28, %42 : vector<16x16xf32>
    %c0_33 = arith.constant 0 : index
    %c0_34 = arith.constant 0 : index
    %44 = vector.load %arg16[%c0_33, %c0_34] : memref<16x16xf32, #tpu.memory_space<vmem>>, vector<16x16xf32>
    %cst_35 = arith.constant dense<0.000000e+00> : vector<16x16xf32>
    %45 = tpu.matmul %28, %44, %cst_35 {dimension_numbers = #tpu.dot_dimension_numbers<[1], [0], [0], [1], [0, 0, 1, 1], [], []>} : vector<16x16xf32>, vector<16x16xf32>, vector<16x16xf32> -> vector<16x16xf32>
    %c0_36 = arith.constant 0 : index
    %c0_37 = arith.constant 0 : index
    %46 = vector.load %arg14[%c0_36, %c0_37] : memref<16x16xf32, #tpu.memory_space<vmem>>, vector<16x16xf32>
    %47 = arith.mulf %45, %46 : vector<16x16xf32>
    %48 = arith.addf %43, %47 : vector<16x16xf32>
    %c0_38 = arith.constant 0 : index
    %c0_39 = arith.constant 0 : index
    %49 = vector.load %arg17[%c0_38, %c0_39] : memref<16x16xf32, #tpu.memory_space<vmem>>, vector<16x16xf32>
    %c0_40 = arith.constant 0 : index
    %c0_41 = arith.constant 0 : index
    %50 = vector.load %arg9[%c0_40, %c0_41] : memref<32x32xf32, #tpu.memory_space<vmem>>, vector<32x32xf32>
    %cst_42 = arith.constant 0.000000e+00 : f32
    %51 = vector.broadcast %cst_42 : f32 to vector<16x32xf32>
    %52 = vector.extract_strided_slice %41 {offsets = [0, 0], sizes = [16, 16], strides = [1, 1]} : vector<16x32xf32> to vector<16x16xf32>
    %cst_43 = arith.constant dense<0.000000e+00> : vector<16x16xf32>
    %53 = tpu.matmul %52, %48, %cst_43 {dimension_numbers = #tpu.dot_dimension_numbers<[1], [1], [0], [0], [0, 0, 1, 0], [], []>} : vector<16x16xf32>, vector<16x16xf32>, vector<16x16xf32> -> vector<16x16xf32>
    %54 = arith.addf %53, %49 : vector<16x16xf32>
    %cst_44 = arith.constant dense<0xFF800000> : vector<16xf32>
    %55 = vector.multi_reduction <maximumf>, %54, %cst_44 [1] : vector<16x16xf32> to vector<16xf32>
    %56 = vector.shape_cast %55 : vector<16xf32> to vector<16x1xf32>
    %57 = vector.broadcast %56 : vector<16x1xf32> to vector<16x16xf32>
    %58 = arith.subf %54, %57 : vector<16x16xf32>
    %59 = math.exp %58 : vector<16x16xf32>
    %cst_45 = arith.constant dense<0.000000e+00> : vector<16xf32>
    %60 = vector.multi_reduction <add>, %59, %cst_45 [1] : vector<16x16xf32> to vector<16xf32>
    %61 = vector.shape_cast %60 : vector<16xf32> to vector<16x1xf32>
    %62 = tpu.reciprocal %61 {approx = true} : vector<16x1xf32> -> vector<16x1xf32>
    %63 = vector.broadcast %62 : vector<16x1xf32> to vector<16x16xf32>
    %64 = arith.mulf %59, %63 : vector<16x16xf32>
    %cst_46 = arith.constant dense<0.000000e+00> : vector<16x16xf32>
    %65 = tpu.matmul %64, %30, %cst_46 {dimension_numbers = #tpu.dot_dimension_numbers<[1], [0], [0], [1], [0, 0, 1, 1], [], []>} : vector<16x16xf32>, vector<16x16xf32>, vector<16x16xf32> -> vector<16x16xf32>
    %66 = vector.extract_strided_slice %50 {offsets = [0, 0], sizes = [16, 32], strides = [1, 1]} : vector<32x32xf32> to vector<16x32xf32>
    %cst_47 = arith.constant dense<0.000000e+00> : vector<16x32xf32>
    %67 = tpu.matmul %65, %66, %cst_47 {dimension_numbers = #tpu.dot_dimension_numbers<[1], [0], [0], [1], [0, 0, 1, 1], [], []>} : vector<16x16xf32>, vector<16x32xf32>, vector<16x32xf32> -> vector<16x32xf32>
    %68 = arith.addf %51, %67 : vector<16x32xf32>
    %69 = vector.extract_strided_slice %41 {offsets = [0, 16], sizes = [16, 16], strides = [1, 1]} : vector<16x32xf32> to vector<16x16xf32>
    %cst_48 = arith.constant dense<0.000000e+00> : vector<16x16xf32>
    %70 = tpu.matmul %69, %48, %cst_48 {dimension_numbers = #tpu.dot_dimension_numbers<[1], [1], [0], [0], [0, 0, 1, 0], [], []>} : vector<16x16xf32>, vector<16x16xf32>, vector<16x16xf32> -> vector<16x16xf32>
    %71 = arith.addf %70, %49 : vector<16x16xf32>
    %cst_49 = arith.constant dense<0xFF800000> : vector<16xf32>
    %72 = vector.multi_reduction <maximumf>, %71, %cst_49 [1] : vector<16x16xf32> to vector<16xf32>
    %73 = vector.shape_cast %72 : vector<16xf32> to vector<16x1xf32>
    %74 = vector.broadcast %73 : vector<16x1xf32> to vector<16x16xf32>
    %75 = arith.subf %71, %74 : vector<16x16xf32>
    %76 = math.exp %75 : vector<16x16xf32>
    %cst_50 = arith.constant dense<0.000000e+00> : vector<16xf32>
    %77 = vector.multi_reduction <add>, %76, %cst_50 [1] : vector<16x16xf32> to vector<16xf32>
    %78 = vector.shape_cast %77 : vector<16xf32> to vector<16x1xf32>
    %79 = tpu.reciprocal %78 {approx = true} : vector<16x1xf32> -> vector<16x1xf32>
    %80 = vector.broadcast %79 : vector<16x1xf32> to vector<16x16xf32>
    %81 = arith.mulf %76, %80 : vector<16x16xf32>
    %cst_51 = arith.constant dense<0.000000e+00> : vector<16x16xf32>
    %82 = tpu.matmul %81, %30, %cst_51 {dimension_numbers = #tpu.dot_dimension_numbers<[1], [0], [0], [1], [0, 0, 1, 1], [], []>} : vector<16x16xf32>, vector<16x16xf32>, vector<16x16xf32> -> vector<16x16xf32>
    %83 = vector.extract_strided_slice %50 {offsets = [16, 0], sizes = [16, 32], strides = [1, 1]} : vector<32x32xf32> to vector<16x32xf32>
    %cst_52 = arith.constant dense<0.000000e+00> : vector<16x32xf32>
    %84 = tpu.matmul %82, %83, %cst_52 {dimension_numbers = #tpu.dot_dimension_numbers<[1], [0], [0], [1], [0, 0, 1, 1], [], []>} : vector<16x16xf32>, vector<16x32xf32>, vector<16x32xf32> -> vector<16x32xf32>
    %85 = arith.addf %68, %84 : vector<16x32xf32>
    %86 = arith.negf %34 : vector<16x64xf32>
    %87 = math.exp %86 : vector<16x64xf32>
    %cst_53 = arith.constant 1.000000e+00 : f32
    %88 = vector.broadcast %cst_53 : f32 to vector<16x64xf32>
    %89 = arith.addf %88, %87 : vector<16x64xf32>
    %90 = arith.divf %88, %89 : vector<16x64xf32>
    %91 = arith.mulf %34, %90 : vector<16x64xf32>
    %92 = arith.mulf %91, %32 : vector<16x64xf32>
    %c0_54 = arith.constant 0 : index
    %c0_55 = arith.constant 0 : index
    %93 = vector.load %arg10[%c0_54, %c0_55] : memref<64x32xf32, #tpu.memory_space<vmem>>, vector<64x32xf32>
    %cst_56 = arith.constant dense<0.000000e+00> : vector<16x32xf32>
    %94 = tpu.matmul %92, %93, %cst_56 {dimension_numbers = #tpu.dot_dimension_numbers<[1], [0], [0], [1], [0, 0, 1, 1], [], []>} : vector<16x64xf32>, vector<64x32xf32>, vector<16x32xf32> -> vector<16x32xf32>
    %95 = arith.addf %85, %94 : vector<16x32xf32>
    %c0_57 = arith.constant 0 : index
    %c0_58 = arith.constant 0 : index
    %96 = vector.load %arg18[%c0_57, %c0_58] : memref<16x32xf32, #tpu.memory_space<vmem>>, vector<16x32xf32>
    tpu.vector_store %arg18[%c0_57, %c0_58], %95 {strides = array<i32>} : memref<16x32xf32, #tpu.memory_space<vmem>>, vector<16x32xf32>,
    return
  }
  func.func @transform_0(%arg0: i32) -> (i32, i32) {
    %c0_i32 = arith.constant 0 : i32
    %c0_i32_0 = arith.constant 0 : i32
    %c0_i32_1 = arith.constant 0 : i32
    return %c0_i32, %c0_i32_0 : i32, i32
  }
  func.func @transform_1(%arg0: i32) -> (i32, i32) {
    %c0_i32 = arith.constant 0 : i32
    %c0_i32_0 = arith.constant 0 : i32
    %c0_i32_1 = arith.constant 0 : i32
    return %c0_i32, %c0_i32_0 : i32, i32
  }
  func.func @transform_2(%arg0: i32) -> (i32, i32) {
    %c0_i32 = arith.constant 0 : i32
    %c0_i32_0 = arith.constant 0 : i32
    %c0_i32_1 = arith.constant 0 : i32
    return %c0_i32, %c0_i32_0 : i32, i32
  }
  func.func @transform_3(%arg0: i32) -> (i32, i32) {
    %c0_i32 = arith.constant 0 : i32
    %c0_i32_0 = arith.constant 0 : i32
    %c0_i32_1 = arith.constant 0 : i32
    return %c0_i32, %c0_i32_0 : i32, i32
  }
  func.func @transform_4(%arg0: i32) -> (i32, i32) {
    %c0_i32 = arith.constant 0 : i32
    %c0_i32_0 = arith.constant 0 : i32
    %c0_i32_1 = arith.constant 0 : i32
    return %c0_i32, %c0_i32_0 : i32, i32
  }
  func.func @transform_5(%arg0: i32) -> (i32, i32) {
    %c0_i32 = arith.constant 0 : i32
    %c0_i32_0 = arith.constant 0 : i32
    %c0_i32_1 = arith.constant 0 : i32
    return %c0_i32, %c0_i32_0 : i32, i32
  }
  func.func @transform_6(%arg0: i32) -> (i32, i32) {
    %c0_i32 = arith.constant 0 : i32
    %c0_i32_0 = arith.constant 0 : i32
    %c0_i32_1 = arith.constant 0 : i32
    return %c0_i32, %c0_i32_0 : i32, i32
  }
  func.func @transform_7(%arg0: i32) -> (i32, i32) {
    %c0_i32 = arith.constant 0 : i32
    %c0_i32_0 = arith.constant 0 : i32
    %c0_i32_1 = arith.constant 0 : i32
    return %c0_i32, %c0_i32_0 : i32, i32
  }
  func.func @transform_8(%arg0: i32) -> (i32, i32) {
    %c0_i32 = arith.constant 0 : i32
    %c0_i32_0 = arith.constant 0 : i32
    %c0_i32_1 = arith.constant 0 : i32
    return %c0_i32, %c0_i32_0 : i32, i32
  }
  func.func @transform_9(%arg0: i32) -> (i32, i32) {
    %c0_i32 = arith.constant 0 : i32
    %c0_i32_0 = arith.constant 0 : i32
    %c0_i32_1 = arith.constant 0 : i32
    return %c0_i32, %c0_i32_0 : i32, i32
  }
  func.func @transform_10(%arg0: i32) -> (i32, i32) {
    %c0_i32 = arith.constant 0 : i32
    %c0_i32_0 = arith.constant 0 : i32
    %c0_i32_1 = arith.constant 0 : i32
    return %c0_i32, %c0_i32_0 : i32, i32
  }
  func.func @transform_11(%arg0: i32) -> (i32, i32) {
    %c0_i32 = arith.constant 0 : i32
    %c0_i32_0 = arith.constant 0 : i32
    %c0_i32_1 = arith.constant 0 : i32
    return %c0_i32, %c0_i32_0 : i32, i32
  }
  func.func @transform_12(%arg0: i32) -> (i32, i32) {
    %c0_i32 = arith.constant 0 : i32
    %c0_i32_0 = arith.constant 0 : i32
    %c0_i32_1 = arith.constant 0 : i32
    return %c0_i32, %c0_i32_0 : i32, i32
  }
  func.func @transform_13(%arg0: i32) -> (i32, i32) {
    %c0_i32 = arith.constant 0 : i32
    %c0_i32_0 = arith.constant 0 : i32
    %c0_i32_1 = arith.constant 0 : i32
    return %c0_i32, %c0_i32_0 : i32, i32
  }
  func.func @transform_14(%arg0: i32) -> (i32, i32) {
    %c0_i32 = arith.constant 0 : i32
    %c0_i32_0 = arith.constant 0 : i32
    %c0_i32_1 = arith.constant 0 : i32
    return %c0_i32, %c0_i32_0 : i32, i32
  }
  func.func @transform_15(%arg0: i32) -> (i32, i32) {
    %c0_i32 = arith.constant 0 : i32
    %c0_i32_0 = arith.constant 0 : i32
    %c0_i32_1 = arith.constant 0 : i32
    return %c0_i32, %c0_i32_0 : i32, i32
  }
  func.func @transform_16(%arg0: i32) -> (i32, i32) {
    %c0_i32 = arith.constant 0 : i32
    %c0_i32_0 = arith.constant 0 : i32
    %c0_i32_1 = arith.constant 0 : i32
    return %c0_i32, %c0_i32_0 : i32, i32
  }
  func.func @transform_17(%arg0: i32) -> (i32, i32) {
    %c0_i32 = arith.constant 0 : i32
    %c0_i32_0 = arith.constant 0 : i32
    %c0_i32_1 = arith.constant 0 : i32
    return %c0_i32, %c0_i32_0 : i32, i32
  }
}

</mosaic_0001>

<bundles_post_ra>
// kernel: parallel_transformer_block.1
= control target key start
LH: loop header
LB: loop body
LE: loop exit
PB: predicated region body
PF: predicated region fallthrough
CT: control target
= control target key end

     0   :  { %s2089_s0 = inlined_call_operand.vmem [shape: f32[16,32], index: 0, kind: input, shape index: {}]   ;;  %s2090_s1 = inlined_call_operand.vmem [shape: f32[1,32], index: 1, kind: input, shape index: {}]   ;;  %s2091_s2 = inlined_call_operand.vmem [shape: f32[1,32], index: 2, kind: input, shape index: {}]   ;;  %s2092_s3 = inlined_call_operand.vmem [shape: f32[32,32], index: 3, kind: input, shape index: {}]   ;;  %s2093_s4 = inlined_call_operand.vmem [shape: f32[32,16], index: 4, kind: input, shape index: {}]   ;;  %s2094_s5 = inlined_call_operand.vmem [shape: f32[32,16], index: 5, kind: input, shape index: {}]   ;;  %s2095_s6 = inlined_call_operand.vmem [shape: f32[32,64], index: 6, kind: input, shape index: {}]   ;;  %s2096_s7 = inlined_call_operand.vmem [shape: f32[32,64], index: 7, kind: input, shape index: {}]   ;;  %s2097_s8 = inlined_call_operand.vmem [shape: f32[32,32], index: 8, kind: input, shape index: {}]   ;;  %s2098_s9 = inlined_call_operand.vmem [shape: f32[64,32], index: 9, kind: input, shape index: {}]   ;;  %s2099_s10 = inlined_call_operand.vmem [shape: f32[16,32], index: 10, kind: input, shape index: {}]   ;;  %s2100_s11 = inlined_call_operand.vmem [shape: f32[16,32], index: 11, kind: input, shape index: {}]   ;;  %s2101_s12 = inlined_call_operand.vmem [shape: f32[16,16], index: 12, kind: input, shape index: {}]   ;;  %s2102_s13 = inlined_call_operand.vmem [shape: f32[16,16], index: 13, kind: input, shape index: {}]   ;;  %s2103_s14 = inlined_call_operand.vmem [shape: f32[32,32], index: 14, kind: input, shape index: {}]   ;;  %s2104_s15 = inlined_call_operand.vmem [shape: f32[16,16], index: 15, kind: input, shape index: {}]   ;;  %s2105_s16 = inlined_call_operand.vmem [shape: f32[16,16], index: 16, kind: input, shape index: {}]   ;;  %s2106_s17 = inlined_call_operand.hbm [shape: f32[16,32], index: 17, kind: output, shape index: {}]  }
   0x1   :  { %2108 = sst [smem:[#allocation5_spill]] %s2089_s0 }
   0x2   :  { %2109 = sst [smem:[#allocation6_spill]] %s2090_s1 }
   0x3   :  { %s2110_s26 = sld [smem:[#allocation5_spill]]  ;;  %vm61_vm0 = vcmask 261120  }
   0x9   :  { %v57_v0 = vld [vmem:[%s2110_s26] sm:$0xff]  ;;  %v58_v1 = vld [vmem:[%s2110_s26 + $0x8] sm:$0xff] }
   0xa   :  { %22 = vsyncpa [#allocation3], 0  ;;  %v62_v2 = vsel %vm61_vm0, %v57_v0, 0.0  ;;  %v65_v3 = vsel %vm61_vm0, %v58_v1, 0.0  ;;  %v105_v14 = vld [vmem:[%s2092_s3] sm:$0xff]  ;;  %v106_v15 = vld [vmem:[%s2092_s3 + $0x8] sm:$0xff] }
   0xb   :  { %63 = vadd.xlane.f32.xlu0 %v62_v2  ;;  %v1609_v16 = vpack.c.bf16 %v106_v15, %v105_v14  ;;  %v348_v17 = vld [vmem:[%s2095_s6] sm:$0xff]  ;;  %v349_v18 = vld [vmem:[%s2095_s6 + $0x8] sm:$0xff]  ;;  %v107_v20 = vld [vmem:[%s2092_s3 + $0x10] sm:$0xff]  ;;  %s2111_s23 = sld [smem:[#allocation6_spill]]  ;;  %vm607_vm1 = vcmask 130048   ;;  %vm1263_vm3 = vcmask 523264  }
   0xc   :  { %v1633_v19 = vpack.c.bf16 %v349_v18, %v348_v17  ;;  %v108_v21 = vld [vmem:[%s2092_s3 + $0x18] sm:$0xff]  ;;  %v350_v23 = vld [vmem:[%s2095_s6 + $0x10] sm:$0xff]  ;;  %v190_v26 = vld [vmem:[%s2093_s4] sm:$0xff] }
   0xd   :  { %1610 = vmatprep.subr.bf16.mxu0 %v1609_v16  ;;  %v1613_v22 = vpack.c.bf16 %v108_v21, %v107_v20  ;;  %v351_v24 = vld [vmem:[%s2095_s6 + $0x18] sm:$0xff]  ;;  %v191_v27 = vld [vmem:[%s2093_s4 + $0x8] sm:$0xff]  ;;  %v510_v29 = vld [vmem:[%s2103_s14] sm:$0xff] }
   0xe   :  { %1612 = vmatpush3.bf16.msra.mxu0 %v1609_v16  ;;  %1634 = vmatprep.subr.bf16.mxu1 %v1633_v19  ;;  %v1637_v25 = vpack.c.bf16 %v351_v24, %v350_v23  ;;  %v1617_v28 = vpack.c.bf16 %v191_v27, %v190_v26  ;;  %v511_v30 = vld [vmem:[%s2103_s14 + $0x8] sm:$0xff]  ;;  %v1366_v41 = vld [vmem:[%s2091_s2] ss:$0 sm:$0xff]  ;;  %v192_v46 = vld [vmem:[%s2093_s4 + $0x10] sm:$0xff] }
   0xf   :  { %66 = vadd.xlane.f32.xlu0 %v65_v3  ;;  %1636 = vmatpush3.bf16.msra.mxu1 %v1633_v19  ;;  %v1649_v31 = vpack.c.bf16 %v511_v30, %v510_v29  ;;  %v193_v47 = vld [vmem:[%s2093_s4 + $0x18] sm:$0xff]  ;;  %v512_v49 = vld [vmem:[%s2103_s14 + $0x10] sm:$0xff]  ;;  %v269_v53 = vld [vmem:[%s2094_s5] sm:$0xff] }
  0x10   :  { %1614 = vmatprep.subr.bf16.mxu0 %v1613_v22  ;;  %1638 = vmatprep.subr.bf16.mxu1 %v1637_v25  ;;  %v513_v50 = vld [vmem:[%s2103_s14 + $0x18] sm:$0xff]  ;;  %v1621_v52 = vpack.c.bf16 %v193_v47, %v192_v46  ;;  %v270_v54 = vld [vmem:[%s2094_s5 + $0x8] sm:$0xff]  ;;  %v271_v57 = vld [vmem:[%s2094_s5 + $0x10] sm:$0xff] }
  0x11   :  { %v1365_v39 = vld [vmem:[%s2111_s23] ss:$0 sm:$0xff]  ;;  %v1653_v55 = vpack.c.bf16 %v513_v50, %v512_v49  ;;  %v1625_v56 = vpack.c.bf16 %v270_v54, %v269_v53  ;;  %v272_v58 = vld [vmem:[%s2094_s5 + $0x18] sm:$0xff]  ;;  %v428_v61 = vld [vmem:[%s2096_s7 + $0x8] sm:$0xff] }
  0x12   :  { %1616 = vmatpush3.bf16.msra.mxu0 %v1613_v22  ;;  %v1629_v59 = vpack.c.bf16 %v272_v58, %v271_v57  ;;  %v427_v60 = vld [vmem:[%s2096_s7] sm:$0xff]  ;;  %v429_v63 = vld [vmem:[%s2096_s7 + $0x10] sm:$0xff]  ;;  %v606_v3 = vld [vmem:[%s2104_s15 + $0x8] sm:$0xff] }
  0x13   :  { %1640 = vmatpush3.bf16.msra.mxu1 %v1637_v25  ;;  %1618 = vmatprep.subr.bf16.mxu0 %v1617_v28  ;;  %v1641_v62 = vpack.c.bf16 %v428_v61, %v427_v60  ;;  %v605_v2 = vld [vmem:[%s2104_s15] sm:$0xff]  ;;  %v596_v29 = vld [vmem:[%s2100_s11 + $0x8] sm:$0xff]  ;;  %vm1998_vm2 = vmpackc.low %vm607_vm1, %vm607_vm1 }
  0x14   :  { %1650 = vmatprep.subr.bf16.mxu1 %v1649_v31  ;;  %v506_v30 = vld [vmem:[%s2099_s10] sm:$0xff]  ;;  %v696_v54 = vld [vmem:[%s2105_s16 + $0x8] sm:$0xff] }
  0x98   :  { %v64_v4 = vpop.xlane.xlu0 %63 }
  0x99   :  { %v69_v5 = vmul.f32 0.03125, %v64_v4  ;;  %v1657_v4 = vpack.c.bf16 %v606_v3, %v605_v2 }
  0x9b   :  { %v71_v6 = vsub.f32 %v57_v0, %v69_v5  ;;  %v430_v0 = vld [vmem:[%s2096_s7 + $0x18] sm:$0xff] }
  0x9c   :  { %v67_v7 = vpop.xlane.xlu0 %66 }
  0x9d   :  { %v70_v8 = vmul.f32 0.03125, %v67_v7  ;;  %v73_v9 = vmul.f32 %v71_v6, %v71_v6 }
  0x9f   :  { %v72_v10 = vsub.f32 %v58_v1, %v70_v8  ;;  %v75_v11 = vsel %vm61_vm0, %v73_v9, 0.0  ;;  %v1645_v1 = vpack.c.bf16 %v430_v0, %v429_v63 }
  0xa0   :  { %76 = vadd.xlane.f32.xlu1 %v75_v11 }
  0xa1   :  { %v74_v12 = vmul.f32 %v72_v10, %v72_v10 }
  0xa3   :  { %v78_v13 = vsel %vm61_vm0, %v74_v12, 0.0 }
  0xa4   :  { %79 = vadd.xlane.f32.xlu1 %v78_v13 }
 0x12d   :  { %v77_v32 = vpop.xlane.xlu1 %76 }
 0x12e   :  { %v81_v33 = vmul.f32 0.03125, %v77_v32 }
 0x130   :  { %v83_v34 = vadd.f32 1e-05, %v81_v33 }
 0x131   :  { %v80_v35 = vpop.xlane.xlu1 %79 }
 0x132   :  { %1713 = vrsqrt.f32 %v83_v34  ;;  %v82_v36 = vmul.f32 0.03125, %v80_v35 }
 0x134   :  { %v84_v37 = vadd.f32 1e-05, %v82_v36 }
 0x136   :  { %1715 = vrsqrt.f32 %v84_v37 }
 0x13c   :  { %v1714_v38 = vpop.eup %1713 }
 0x13d   :  { %v87_v40 = vmul.f32 %v1714_v38, %v71_v6 }
 0x13f   :  { %v95_v42 = vmul.f32 %v1365_v39, %v87_v40  ;;  %v602_v40 = vld [vmem:[%s2101_s12 + $0x8] sm:$0xff] }
 0x140   :  { %v1716_v43 = vpop.eup %1715 }
 0x141   :  { %v88_v44 = vmul.f32 %v1716_v43, %v72_v10  ;;  %v103_v45 = vadd.f32 %v1366_v41, %v95_v42  ;;  %v601_v42 = vld [vmem:[%s2101_s12] sm:$0xff]  ;;  %s1766_s12 = smov [#allocation2]  }
 0x142   :  { %v689_v43 = vld [vmem:[%s2102_s13] sm:$0xff] }
 0x143   :  { %1483 = vmatprep.mubr.msk.f32.mxu0 %vm61_vm0, %v103_v45  ;;  %1516 = vmatprep.mubr.msk.f32.mxu1 %vm61_vm0, %v103_v45  ;;  %v96_v48 = vmul.f32 %v1365_v39, %v88_v44 }
 0x145   :  { %v104_v51 = vadd.f32 %v1366_v41, %v96_v48  ;;  %v690_v41 = vld [vmem:[%s2102_s13 + $0x8] sm:$0xff]  ;;  %s1354_s13 = sshll.u32 %s1766_s12, 4  ;;  %s1355_s13 = int_to_ptr.vmem [resolvable:$true] %s1354_s13 }
 0x146   :  { %s1741_s25 = scalar_lea.vmem %s1355_s13, 256  ;;  %p1746_p1 = scmp.lt.s32.totalorder %s1355_s13, %s1355_s13 }
 0x147   :  { %1484 = vmatmul.mubr.msk.f32.vlgmr.msra.gmra.mrb[0].mxu0 %vm61_vm0, %v104_v51  ;;  %1517 = vmatmul.mubr.msk.f32.vlgmr.msra.gmra.mrb[0].mxu1 %vm61_vm0, %v104_v51  ;;  %p1742_p0 = scmp.ne.s32.totalorder %s1355_s13, %s1741_s25  ;;  %p1747_p2 = scmp.lt.s32.totalorder %s1741_s25, %s1741_s25 }
 0x148   :  { %1620 = vmatpush3.bf16.msra.mxu0 %v1617_v28  ;;  %1494 = vmatprep.mubr.msk.f32.mxu0 %vm61_vm0, %v103_v45  ;;  %v507_v28 = vld [vmem:[%s2099_s10 + $0x8] sm:$0xff] }
 0x149   :  { %1622 = vmatprep.subr.bf16.mxu0 %v1621_v52  ;;  %1652 = vmatpush3.bf16.msra.mxu1 %v1649_v31  ;;  %v595_v31 = vld [vmem:[%s2100_s11] sm:$0xff]  ;;  %p1748_p3 = por %p1747_p2, %p1746_p1 }
 0x14a   :  { %1654 = vmatprep.subr.bf16.mxu1 %v1653_v55 }
 0x14b   :  { %p1749_p4 = pnand %p1748_p3, %p1742_p0 }
 0x14c   :  { %1624 = vmatpush3.bf16.msra.mxu0 %v1621_v52 }
 0x14d   :  { %1626 = vmatprep.subr.bf16.mxu0 %v1625_v56  ;;  %1656 = vmatpush3.bf16.msra.mxu1 %v1653_v55  ;;  %v695_v55 = vld [vmem:[%s2105_s16] sm:$0xff]  ;;  %s1765_s16 = smov 112  }
 0x14f   :  { %1495 = vmatmul.mubr.msk.f32.vlgmr.msra.gmra.mrb[2].mxu0 %vm61_vm0, %v104_v51 }
 0x150   :  { %1628 = vmatpush3.bf16.msra.mxu0 %v1625_v56  ;;  %1505 = vmatprep.mubr.msk.f32.mxu0 %vm61_vm0, %v103_v45 }
 0x151   :  { %1630 = vmatprep.subr.bf16.mxu0 %v1629_v59 }
 0x154   :  { %1632 = vmatpush3.bf16.msra.mxu0 %v1629_v59 }
 0x155   :  { %1642 = vmatprep.subr.bf16.mxu0 %v1641_v62 }
 0x157   :  { %1506 = vmatmul.mubr.msk.f32.vlgmr.msra.gmra.mrb[4].mxu0 %vm61_vm0, %v104_v51 }
 0x158   :  { %1644 = vmatpush3.bf16.msra.mxu0 %v1641_v62  ;;  %1527 = vmatprep.mubr.msk.f32.mxu0 %vm61_vm0, %v103_v45 }
 0x159   :  { %1646 = vmatprep.subr.bf16.mxu0 %v1645_v1 }
 0x15c   :  { %1648 = vmatpush3.bf16.msra.mxu0 %v1645_v1 }
 0x15d   :  { %1658 = vmatprep.subr.bf16.mxu0 %v1657_v4 }
 0x15f   :  { %1528 = vmatmul.mubr.msk.f32.vlgmr.msra.gmra.mrb[6].mxu0 %vm61_vm0, %v104_v51 }
 0x160   :  { %1660 = vmatpush3.bf16.msra.mxu0 %v1657_v4 }
 0x21a   :  { %v1485_v5 = vpop.f32.mrb[0].mxu0  ;;  %v1518_v6 = vpop.f32.mrb[0].mxu1 }
 0x21b   :  { %v181_v7 = vpop.f32.mrb[1].mxu0  ;;  %v418_v8 = vpop.f32.mrb[1].mxu1  ;;  %v509_v33 = vmul.f32 %v1485_v5, %v507_v28 }
 0x21c   :  { %1538 = vmatprep.mubr.msk.f32.mxu1 %vm61_vm0, %v181_v7  ;;  %v508_v36 = vmul.f32 %v506_v30, %v181_v7 }
 0x21d   :  { %1539 = vmatmul.mubr.msk.f32.vlgmr.msra.gmra.mrb[2].mxu1 %vm61_vm0, %v1485_v5 }
 0x222   :  { %v1496_v9 = vpop.f32.mrb[2].mxu0 }
 0x223   :  { %v260_v10 = vpop.f32.mrb[3].mxu0  ;;  %v604_v45 = vmul.f32 %v1496_v9, %v602_v40 }
 0x224   :  { %1545 = vmatprep.mubr.msk.f32.mxu0 %vm607_vm1, %v260_v10  ;;  %v603_v48 = vmul.f32 %v601_v42, %v260_v10 }
 0x225   :  { %1546 = vmatmul.mubr.msk.f32.vlgmr.msra.gmra.mrb[8].mxu0 %vm607_vm1, %v1496_v9 }
 0x22a   :  { %v1507_v11 = vpop.f32.mrb[4].mxu0 }
 0x22b   :  { %v339_v12 = vpop.f32.mrb[5].mxu0 }
 0x22c   :  { %v1667_v13 = vpack.c.bf16 %v1507_v11, %v339_v12 }
 0x22e   :  { %1668 = vmatprep.subr.bf16.mxu0 %v1667_v13 }
 0x22f   :  { %1670 = vmatpush3.bf16.msra.mxu0 %v1667_v13 }
 0x232   :  { %v1529_v14 = vpop.f32.mrb[6].mxu0 }
 0x233   :  { %v1398_v15 = vmul.f32 -1.442695, %v1529_v14  ;;  %v497_v16 = vpop.f32.mrb[7].mxu0 }
 0x234   :  { %v1397_v17 = vmul.f32 -1.442695, %v497_v16 }
 0x235   :  { %1717 = vpow2.f32 %v1398_v15 }
 0x236   :  { %1719 = vpow2.f32 %v1397_v17 }
 0x23f   :  { %v1718_v18 = vpop.eup %1717 }
 0x240   :  { %v1720_v19 = vpop.eup %1719  ;;  %v1246_v20 = vadd.f32 1.0, %v1718_v18 }
 0x241   :  { %v1245_v21 = vadd.f32 1.0, %v1720_v19 }
 0x242   :  { %1721 = vrcp.f32 %v1246_v20 }
 0x243   :  { %1723 = vrcp.f32 %v1245_v21 }
 0x24c   :  { %v1722_v22 = vpop.eup %1721 }
 0x24d   :  { %v1724_v23 = vpop.eup %1723  ;;  %v1252_v24 = vmul.f32 %v1722_v22, %v1529_v14 }
 0x24e   :  { %v1251_v25 = vmul.f32 %v1724_v23, %v497_v16 }
 0x24f   :  { %v1967_v26 = vmul.f32 %v1518_v6, %v1252_v24 }
 0x250   :  { %v1969_v27 = vmul.f32 %v1251_v25, %v418_v8 }
 0x2f0   :  { %v1540_v32 = vpop.f32.mrb[2].mxu1 }
 0x2f1   :  { %v598_v34 = vmul.f32 %v1540_v32, %v596_v29  ;;  %v586_v35 = vpop.f32.mrb[3].mxu1 }
 0x2f2   :  { %v597_v37 = vmul.f32 %v595_v31, %v586_v35 }
 0x2f3   :  { %v600_v38 = vadd.f32 %v598_v34, %v509_v33 }
 0x2f4   :  { %v599_v39 = vadd.f32 %v597_v37, %v508_v36  ;;  %v699_v36 = vld [vmem:[%s2097_s8 + $0x10] sm:$0xff]  ;;  %v700_v37 = vld [vmem:[%s2097_s8 + $0x18] sm:$0xff] }
 0x2f6   :  { %1552 = vmatprep.mubr.msk.f32.mxu1 %vm607_vm1, %v599_v39 }
 0x2f8   :  { %v1547_v44 = vpop.f32.mrb[8].mxu0 }
 0x2f9   :  { %v692_v46 = vmul.f32 %v1547_v44, %v690_v41  ;;  %v680_v47 = vpop.f32.mrb[9].mxu0 }
 0x2fa   :  { %v691_v49 = vmul.f32 %v689_v43, %v680_v47 }
 0x2fb   :  { %v694_v50 = vadd.f32 %v692_v46, %v604_v45  ;;  %v697_v45 = vld [vmem:[%s2097_s8] sm:$0xff]  ;;  %v698_v46 = vld [vmem:[%s2097_s8 + $0x8] sm:$0xff] }
 0x2fc   :  { %v693_v51 = vadd.f32 %v691_v49, %v603_v48  ;;  %v1685_v47 = vpack.c.bf16 %v698_v46, %v697_v45  ;;  %v1255_v48 = vld [vmem:[%s2098_s9] sm:$0xff]  ;;  %v1256_v49 = vld [vmem:[%s2098_s9 + $0x8] sm:$0xff] }
 0x2fd   :  { %v1689_v52 = vpack.c.bf16 %v1256_v49, %v1255_v48 }
 0x2fe   :  { %v1661_v53 = vpack.c.bf16 %v694_v50, %v693_v51 }
 0x300   :  { %1663 = vmatprep.subr.msk.bf16.mxu1 %vm1998_vm2, %v1661_v53  ;;  %1673 = vmatprep.subr.msk.bf16.mxu0 %vm1998_vm2, %v1661_v53 }
 0x301   :  { %1666 = vmatpush3.bf16.xpose.msk.msra.mxu1 %vm1998_vm2, %v1661_v53 }
 0x302   :  { %1678 = vmatprep.subr.bf16.mxu1 %v1667_v13 }
 0x308   :  { %1553 = vmatmul.mubr.msk.f32.vlgmr.msra.gmra.mrb[4].mxu1 %vm607_vm1, %v600_v38 }
 0x309   :  { %1680 = vmatpush3.bf16.msra.mxu1 %v1667_v13 }
 0x3db   :  { %v1554_v56 = vpop.f32.mrb[4].mxu1 }
 0x3dc   :  { %v785_v57 = vadd.f32 %v1554_v56, %v696_v54  ;;  %v779_v58 = vpop.f32.mrb[5].mxu1  ;;  %v1259_v56 = vld [vmem:[%s2098_s9 + $0x20] sm:$0xff] }
 0x3dd   :  { %v780_v59 = vadd.f32 %v779_v58, %v695_v55 }
 0x3de   :  { %v791_v60 = vsel %vm607_vm1, %v785_v57, -inf }
 0x3df   :  { %792 = vmax.xlane.f32.xlu1 %v791_v60  ;;  %v788_v61 = vsel %vm607_vm1, %v780_v59, -inf  ;;  %v1262_v60 = vld [vmem:[%s2098_s9 + $0x38] sm:$0xff] }
 0x3e0   :  { %789 = vmax.xlane.f32.xlu0 %v788_v61 }
 0x46c   :  { %v793_v62 = vpop.xlane.xlu1 %792 }
 0x46d   :  { %v795_v63 = vsub.f32 %v785_v57, %v793_v62  ;;  %v790_v0 = vpop.xlane.xlu0 %789  ;;  %v1260_v57 = vld [vmem:[%s2098_s9 + $0x28] sm:$0xff] }
 0x46e   :  { %v794_v1 = vsub.f32 %v780_v59, %v790_v0  ;;  %v1697_v58 = vpack.c.bf16 %v1260_v57, %v1259_v56  ;;  %v1261_v59 = vld [vmem:[%s2098_s9 + $0x30] sm:$0xff] }
 0x46f   :  { %v798_v2 = vmul.f32 1.442695, %v795_v63  ;;  %v1701_v61 = vpack.c.bf16 %v1262_v60, %v1261_v59 }
 0x470   :  { %v796_v3 = vmul.f32 1.442695, %v794_v1 }
 0x471   :  { %1725 = vpow2.f32 %v798_v2 }
 0x472   :  { %1727 = vpow2.f32 %v796_v3 }
 0x47b   :  { %v1726_v4 = vpop.eup %1725 }
 0x47c   :  { %v1728_v5 = vpop.eup %1727  ;;  %v803_v6 = vsel %vm607_vm1, %v1726_v4, 0.0 }
 0x47d   :  { %804 = vadd.xlane.f32.xlu1 %v803_v6  ;;  %v800_v7 = vsel %vm607_vm1, %v1728_v5, 0.0 }
 0x47e   :  { %801 = vadd.xlane.f32.xlu0 %v800_v7 }
 0x48e   :  { %893 = vrot.lane.b32.xlu1 %v600_v38, %s1765_s16  ;;  %v1681_v38 = vpack.c.bf16 %v700_v37, %v699_v36 }
 0x490   :  { %1682 = vmatprep.subr.bf16.mxu1 %v1681_v38 }
 0x494   :  { %891 = vrot.lane.b32.xlu0 %v599_v39, %s1765_s16 }
 0x50a   :  { %v805_v8 = vpop.xlane.xlu1 %804 }
 0x50b   :  { %1729 = vrcp.f32 %v805_v8  ;;  %v802_v9 = vpop.xlane.xlu0 %801 }
 0x50c   :  { %1731 = vrcp.f32 %v802_v9 }
 0x50e   :  { %v894_v15 = vpop.permute.xlu1 %893 }
 0x50f   :  { %v892_v14 = vpop.permute.xlu0 %891 }
 0x515   :  { %v1730_v10 = vpop.eup %1729 }
 0x516   :  { %v1732_v11 = vpop.eup %1731  ;;  %v809_v13 = vmul.f32 %v1730_v10, %v1726_v4 }
 0x517   :  { %v808_v12 = vmul.f32 %v1732_v11, %v1728_v5 }
 0x519   :  { %1559 = vmatprep.mubr.msk.f32.mxu0 %vm607_vm1, %v808_v12 }
 0x51a   :  { %1560 = vmatmul.mubr.msk.f32.vlgmr.msra.gmra.mrb[10].mxu0 %vm607_vm1, %v809_v13 }
 0x51b   :  { %1676 = vmatpush3.bf16.xpose.msk.msra.mxu0 %vm1998_vm2, %v1661_v53  ;;  %1566 = vmatprep.mubr.msk.f32.mxu0 %vm607_vm1, %v892_v14  ;;  %v1257_v53 = vld [vmem:[%s2098_s9 + $0x10] sm:$0xff] }
 0x522   :  { %1567 = vmatmul.mubr.msk.f32.vlgmr.msra.gmra.mrb[12].mxu0 %vm607_vm1, %v894_v15 }
 0x5ed   :  { %v1561_v16 = vpop.f32.mrb[10].mxu0 }
 0x5ee   :  { %v882_v17 = vpop.f32.mrb[11].mxu0 }
 0x5f5   :  { %v1568_v18 = vpop.f32.mrb[12].mxu0 }
 0x5f6   :  { %v971_v19 = vadd.f32 %v1568_v18, %v696_v54  ;;  %v965_v20 = vpop.f32.mrb[13].mxu0  ;;  %v1258_v54 = vld [vmem:[%s2098_s9 + $0x18] sm:$0xff] }
 0x5f7   :  { %v966_v21 = vadd.f32 %v965_v20, %v695_v55  ;;  %v1693_v55 = vpack.c.bf16 %v1258_v54, %v1257_v53 }
 0x5f8   :  { %v977_v22 = vsel %vm607_vm1, %v971_v19, -inf }
 0x5f9   :  { %978 = vmax.xlane.f32.xlu0 %v977_v22  ;;  %v974_v23 = vsel %vm607_vm1, %v966_v21, -inf }
 0x5fa   :  { %975 = vmax.xlane.f32.xlu1 %v974_v23 }
 0x686   :  { %v979_v24 = vpop.xlane.xlu0 %978 }
 0x687   :  { %v981_v25 = vsub.f32 %v971_v19, %v979_v24  ;;  %v976_v28 = vpop.xlane.xlu1 %975 }
 0x688   :  { %v980_v29 = vsub.f32 %v966_v21, %v976_v28 }
 0x689   :  { %v984_v30 = vmul.f32 1.442695, %v981_v25 }
 0x68a   :  { %v982_v31 = vmul.f32 1.442695, %v980_v29 }
 0x68b   :  { %1733 = vpow2.f32 %v984_v30 }
 0x68c   :  { %1735 = vpow2.f32 %v982_v31 }
 0x695   :  { %v1734_v32 = vpop.eup %1733 }
 0x696   :  { %v1736_v33 = vpop.eup %1735  ;;  %v989_v34 = vsel %vm607_vm1, %v1734_v32, 0.0 }
 0x697   :  { %990 = vadd.xlane.f32.xlu1 %v989_v34  ;;  %v986_v35 = vsel %vm607_vm1, %v1736_v33, 0.0 }
 0x698   :  { %987 = vadd.xlane.f32.xlu0 %v986_v35 }
 0x724   :  { %v991_v39 = vpop.xlane.xlu1 %990 }
 0x725   :  { %1737 = vrcp.f32 %v991_v39  ;;  %v988_v40 = vpop.xlane.xlu0 %987 }
 0x726   :  { %1739 = vrcp.f32 %v988_v40 }
 0x72f   :  { %v1738_v41 = vpop.eup %1737 }
 0x730   :  { %v1740_v42 = vpop.eup %1739  ;;  %v995_v44 = vmul.f32 %v1738_v41, %v1734_v32 }
 0x731   :  { %v994_v43 = vmul.f32 %v1740_v42, %v1736_v33 }
 0x733   :  { %1573 = vmatprep.mubr.msk.f32.mxu1 %vm607_vm1, %v994_v43 }
 0x734   :  { %1574 = vmatmul.mubr.msk.f32.vlgmr.msra.gmra.mrb[6].mxu1 %vm607_vm1, %v995_v44 }
 0x735   :  { %1684 = vmatpush3.bf16.msra.mxu1 %v1681_v38 }
 0x736   :  { %1686 = vmatprep.subr.bf16.mxu1 %v1685_v47 }
 0x807   :  { %v1575_v50 = vpop.f32.mrb[6].mxu1 }
 0x808   :  { %v1068_v51 = vpop.f32.mrb[7].mxu1 }
 0x809   :  { %1580 = vmatprep.mubr.msk.f32.mxu1 %vm607_vm1, %v1068_v51 }
 0x80a   :  { %1581 = vmatmul.mubr.msk.f32.vlgmr.msra.gmra.mrb[8].mxu1 %vm607_vm1, %v1575_v50 }
 0x80b   :  { %1688 = vmatpush3.bf16.msra.mxu1 %v1685_v47  ;;  %1587 = vmatprep.mubr.msk.f32.mxu1 %vm607_vm1, %v882_v17 }
 0x80c   :  { %1690 = vmatprep.subr.bf16.mxu1 %v1689_v52 }
 0x812   :  { %1588 = vmatmul.mubr.msk.f32.vlgmr.msra.gmra.mrb[8].mxu1 %vm607_vm1, %v1561_v16 }
 0x813   :  { %1692 = vmatpush3.bf16.msra.mxu1 %v1689_v52  ;;  %1606 = vmatprep.mubr.msk.f32.mxu1 %vm1263_vm3, %v1969_v27 }
 0x814   :  { %1694 = vmatprep.subr.bf16.mxu1 %v1693_v55 }
 0x817   :  { %1696 = vmatpush3.bf16.msra.mxu1 %v1693_v55 }
 0x818   :  { %1698 = vmatprep.subr.bf16.mxu1 %v1697_v58 }
 0x81b   :  { %1700 = vmatpush3.bf16.msra.mxu1 %v1697_v58 }
 0x81c   :  { %1702 = vmatprep.subr.bf16.mxu1 %v1701_v61 }
 0x81f   :  { %1704 = vmatpush3.bf16.msra.mxu1 %v1701_v61 }
 0x822   :  { %1607 = vmatmul.mubr.msk.f32.vlgmr.msra.gmra.mrb[8].mxu1 %vm1263_vm3, %v1967_v26 }
 0x8f5   :  { %v1608_v27 = vpop.f32.mrb[8].mxu1 }
 0x8f6   :  { %1348 = vst.msk [vmem:[#allocation2 + $0x8] sm:$0xff] %vm61_vm0, %v1608_v27  ;;  %v1336_v62 = vpop.f32.mrb[9].mxu1 }
 0x8f7   :  { %1347 = vst.msk [vmem:[#allocation2] sm:$0xff] %vm61_vm0, %v1336_v62 }
 0x8f8   :  { %1752 = shalt.err (!%p1749_p4)
}
 0x8f9   :  { %s1753_s16 = scalar_lea.hbm %s2106_s17, 256 }
 0x8fa   :  { %p1754_p5 = scmp.ne.s32.totalorder %s2106_s17, %s1753_s16  ;;  %p1757_p6 = scmp.lt.u32.totalorder %s1753_s16, %s2106_s17 }
 0x8fc   :  { %p1759_p7 = pnand %p1757_p6, %p1754_p5 }
 0x8fe   :  { %1762 = shalt.err (!%p1759_p7)
}
 0x8ff   :  { %s1767_s0 = smov 128   ;;  %s1768_s30 = smov 8  }
 0x900   :  { %1360 = dma.vmem_to_hbm [thread:$0]  %s1355_s13, 256, %s2106_s17, [#allocation3], %s1767_s0, %s1767_s0, %s1768_s30  }
 0x901   :  { %1763 = dma.done.wait [#allocation3], 256  }
 0x902   :  { %1764 = vsyncadd [#allocation3], 4294967040 }
 0x903   :  { %1364 = vsyncpa [#allocation3], 1 }

</bundles_post_ra>
